<compile_context>
chip_gen: v7x
topology: tpu7x:2x2x1
jax: 0.10.0
libtpu: 0.0.40
codegen_flags: <defaults>
</compile_context>

<pallas_src>
import functools

import jax
import jax.numpy as jnp
from jax.experimental import pallas as pl
from jax.experimental.pallas import tpu as pltpu


def _round_up(x, m):
    return ((x + m - 1) // m) * m


def _device_kind():
    try:
        return jax.devices()[0].device_kind.lower()
    except Exception:
        return ""


def _gen_config():
    """Per-TPU-generation tiling and VMEM budgets (bytes)."""
    kind = _device_kind()
    if ("v5 lite" in kind) or ("v5e" in kind) or ("v5lite" in kind):
        # v5e: 128 MiB VMEM, most bandwidth-starved -> biggest tiles, resident B.
        return dict(tm=1024, tn=256, tk=2048,
                    resident_b_bytes=24 * 1024 * 1024,
                    vmem_cap=100 * 1024 * 1024)
    if "v7" in kind:
        # v7x: only 64 MiB physical VMEM (32 MiB default scoped) -> tighter budgets.
        return dict(tm=512, tn=256, tk=1024,
                    resident_b_bytes=8 * 1024 * 1024,
                    vmem_cap=40 * 1024 * 1024)
    # v6e (default): 256-wide MXU, 128 MiB VMEM.
    return dict(tm=1024, tn=256, tk=2048,
                resident_b_bytes=24 * 1024 * 1024,
                vmem_cap=100 * 1024 * 1024)


def _plan_tiles(M, K, C, compute_dtype):
    """Single source of truth for tile sizes / padded dims (idempotent under padding)."""
    cfg = _gen_config()
    itm = jnp.dtype(compute_dtype).itemsize
    pack = 8 * (4 // itm)                       # sublane packing: bf16 -> 16 rows, f32 -> 8
    tm = min(cfg["tm"], _round_up(M, pack))
    tn = min(cfg["tn"], _round_up(C, 128))      # lane-dense output tile (unmasked stores)
    tk = min(cfg["tk"], _round_up(K, 128))
    Mp, Kp, Cp = _round_up(M, tm), _round_up(K, tk), _round_up(C, tn)
    return cfg, tm, tn, tk, Mp, Kp, Cp


def _pad_cast(a, rows_p, cols_p, dtype):
    """Zero-pad to (rows_p, cols_p) and cast. Fast path: zero-copy if already padded+typed."""
    r, c = a.shape
    if (r, c) == (rows_p, cols_p) and a.dtype == jnp.dtype(dtype):
        return a
    out = jnp.zeros((rows_p, cols_p), dtype)
    return out.at[:r, :c].set(a.astype(dtype))


# --------------------------------------------------------------------------- kernels
def _mm_kernel_stream(a_ref, b_ref, o_ref, acc_ref, *, apply_relu):
    """One (tm, tn) output tile; B streamed as (tk, tn) blocks; f32 VMEM accumulator."""
    k = pl.program_id(2)

    @pl.when(k == 0)
    def _():
        acc_ref[...] = jnp.zeros_like(acc_ref)

    acc_ref[...] += jnp.dot(a_ref[...], b_ref[...],
                            preferred_element_type=jnp.float32)

    @pl.when(k == pl.num_programs(2) - 1)
    def _():
        out = acc_ref[...]
        if apply_relu:
            out = jnp.maximum(out, 0.0)
        o_ref[...] = out.astype(o_ref.dtype)


def _mm_kernel_resident_b(a_ref, b_ref, o_ref, acc_ref, *, apply_relu, tk):
    """Same, but B is fully VMEM-resident (Kp, tn); slice the K block in-kernel."""
    k = pl.program_id(2)

    @pl.when(k == 0)
    def _():
        acc_ref[...] = jnp.zeros_like(acc_ref)

    start = pl.multiple_of(k * tk, tk)
    acc_ref[...] += jnp.dot(a_ref[...], b_ref[pl.ds(start, tk), :],
                            preferred_element_type=jnp.float32)

    @pl.when(k == pl.num_programs(2) - 1)
    def _():
        out = acc_ref[...]
        if apply_relu:
            out = jnp.maximum(out, 0.0)
        o_ref[...] = out.astype(o_ref.dtype)


# --------------------------------------------------------------------------- wrapper
def pallas_matmul(a, b, *, apply_relu=False, out_dtype=jnp.float32,
                  compute_dtype=jnp.bfloat16):
    """out = act(a @ b) via a K-tiled Pallas MXU kernel.  a: [M, K], b: [K, C].

    Inputs may already be zero-padded/cast (from prepare_adjacency / graph_convolution);
    in that case the pad/cast here is a zero-copy fast path."""
    M, K = a.shape
    K2, C = b.shape
    assert K == K2, (a.shape, b.shape)

    cfg, tm, tn, tk, Mp, Kp, Cp = _plan_tiles(M, K, C, compute_dtype)
    itm = jnp.dtype(compute_dtype).itemsize
    out_itm = jnp.dtype(out_dtype).itemsize

    a_p = _pad_cast(a, Mp, Kp, compute_dtype)
    b_p = _pad_cast(b, Kp, Cp, compute_dtype)

    grid = (Mp // tm, Cp // tn, Kp // tk)

    # Make B fully VMEM-resident when the whole (Kp, tn) strip fits the per-gen budget
    # and there is a single column block (the common GCN case, C <= 256).  This removes
    # all Mp/tm re-reads of B from HBM; adj becomes the only streamed operand.
    b_strip_bytes = Kp * tn * itm
    resident_b = (Cp == tn) and (b_strip_bytes <= cfg["resident_b_bytes"])

    if resident_b:
        b_spec = pl.BlockSpec((Kp, tn), lambda i, j, k: (0, j))
        kernel = functools.partial(_mm_kernel_resident_b, apply_relu=apply_relu, tk=tk)
        b_hbm_bytes = Kp * Cp * itm                      # read exactly once
        b_vmem_bytes = 2 * b_strip_bytes                 # conservative (double-buffered)
    else:
        b_spec = pl.BlockSpec((tk, tn), lambda i, j, k: (k, j))
        kernel = functools.partial(_mm_kernel_stream, apply_relu=apply_relu)
        b_hbm_bytes = (Mp // tm) * Kp * Cp * itm         # re-streamed per row tile
        b_vmem_bytes = 2 * tk * tn * itm

    vmem_bytes = (2 * tm * tk * itm          # a blocks, double-buffered
                  + b_vmem_bytes             # b blocks / resident strip
                  + 2 * tm * tn * out_itm    # output blocks
                  + tm * tn * 4)             # f32 accumulator scratch
    vmem_limit = int(min(max(int(vmem_bytes * 1.5), 16 * 1024 * 1024), cfg["vmem_cap"]))

    out_p = pl.pallas_call(
        kernel,
        out_shape=jax.ShapeDtypeStruct((Mp, Cp), out_dtype),
        grid_spec=pltpu.PrefetchScalarGridSpec(
            num_scalar_prefetch=0,
            grid=grid,
            in_specs=[
                pl.BlockSpec((tm, tk), lambda i, j, k: (i, k)),   # adj / x row-K block
                b_spec,                                           # B: resident or streamed
            ],
            out_specs=pl.BlockSpec((tm, tn), lambda i, j, k: (i, j)),
            scratch_shapes=[pltpu.VMEM((tm, tn), jnp.float32)],
        ),
        compiler_params=pltpu.CompilerParams(
            dimension_semantics=("parallel", "parallel", "arbitrary"),
            vmem_limit_bytes=vmem_limit,
        ),
        cost_estimate=pl.CostEstimate(
            flops=2 * Mp * Kp * Cp,
            transcendentals=0,
            bytes_accessed=Mp * Kp * itm + b_hbm_bytes + Mp * Cp * out_itm,
        ),
    )(a_p, b_p)
    return out_p[:M, :C]


# --------------------------------------------------------------------------- module
def prepare_adjacency(adj, compute_dtype=jnp.bfloat16):
    """Pad + cast the dense normalized adjacency ONCE, using the exact tile plan the
    adj matmul will use, so every graph_convolution call hits the zero-copy fast path."""
    n = adj.shape[0]
    _, _, _, _, Mp, Kp, _ = _plan_tiles(n, adj.shape[1], 128, compute_dtype)
    return _pad_cast(adj, Mp, Kp, compute_dtype)


def graph_convolution(x, adj, W, *, featureless=False, act=None, n_nodes=None,
                      out_dtype=jnp.float32, compute_dtype=jnp.bfloat16):
    """Eval-mode forward of GraphConvolution.

    x:   [N, input_dim] node features (ignored when featureless, as in the module)
    adj: [N, N] dense normalized adjacency, possibly pre-padded/cast via prepare_adjacency
         (pass n_nodes=N in that case)
    W:   [input_dim, output_dim]
    """
    N = int(n_nodes) if n_nodes is not None else adj.shape[0]
    C = W.shape[1]

    # TODO(synk): training-mode dropout (self.dropout) is not implemented (eval = identity).
    if featureless:
        pre_sup = W                                            # pre_sup = W
    else:
        # pre_sup = x @ W, kept in bf16 (no f32 round trip for the intermediate).
        pre_sup = pallas_matmul(x, W, out_dtype=compute_dtype,
                                compute_dtype=compute_dtype)

    # Pad adj / pre_sup to the exact (Mp, Kp) / (Kp, Cp) the adj matmul will use.
    # For a prepared adj both are zero-copy fast paths inside pallas_matmul.
    _, _, _, _, Mp, Kp, Cp = _plan_tiles(adj.shape[0], adj.shape[1], C, compute_dtype)
    adj_p = _pad_cast(adj, Mp, Kp, compute_dtype)
    pre_sup_p = _pad_cast(pre_sup, Kp, Cp, compute_dtype)

    # out = adj @ pre_sup, optional ReLU fused into the last K step of the kernel.
    out = pallas_matmul(adj_p, pre_sup_p, apply_relu=(act == "relu"),
                        out_dtype=out_dtype, compute_dtype=compute_dtype)
    return out[:N, :C]


# --------------------------------------------------------------------------- reference
def reference_gcn(adj, w1, w2):
    """Pure-JAX reference with the same bf16-operand / f32-accumulate numerics."""
    adj_b = adj.astype(jnp.bfloat16)
    h = jax.nn.relu(jnp.dot(adj_b, w1.astype(jnp.bfloat16),
                            preferred_element_type=jnp.float32)).astype(jnp.bfloat16)
    ps = jnp.dot(h, w2.astype(jnp.bfloat16),
                 preferred_element_type=jnp.float32).astype(jnp.bfloat16)
    return jnp.dot(adj_b, ps, preferred_element_type=jnp.float32)


# --------------------------------------------------------------------------- main
if __name__ == "__main__":
    N = 64          # num nodes (== input_dim for the featureless first layer)
    HIDDEN = 32
    NCLASS = 8

    key = jax.random.PRNGKey(0)
    k_adj, k_w1, k_w2, k_x = jax.random.split(key, 4)

    # deterministic symmetric normalized adjacency
    a = jax.random.uniform(k_adj, (N, N), dtype=jnp.float32)
    a = 0.5 * (a + a.T) + jnp.eye(N, dtype=jnp.float32)
    d_inv_sqrt = 1.0 / jnp.sqrt(jnp.sum(a, axis=1))
    adj = a * d_inv_sqrt[:, None] * d_inv_sqrt[None, :]

    # parameters: same shapes / init distribution as the PyTorch module (torch.randn)
    w1 = jax.random.normal(k_w1, (N, HIDDEN), dtype=jnp.float32)
    w2 = jax.random.normal(k_w2, (HIDDEN, NCLASS), dtype=jnp.float32)
    # x only passes through dropout in the featureless layer and is then discarded
    x = jax.random.normal(k_x, (N, N), dtype=jnp.float32)

    # Hoisted: adjacency is padded + cast to bf16 ONCE and reused by both layers.
    adj_prep = prepare_adjacency(adj)

    # Two-layer TextGCN usage of GraphConvolution (bf16 intermediate between layers):
    h = graph_convolution(x, adj_prep, w1, featureless=True, act="relu",
                          n_nodes=N, out_dtype=jnp.bfloat16)                 # layer1
    out = graph_convolution(h, adj_prep, w2, featureless=False, act=None,
                            n_nodes=N, out_dtype=jnp.float32)                # layer2
    out = jax.block_until_ready(out)

    ref = reference_gcn(adj, w1, w2)
    assert out.shape == (N, NCLASS), out.shape
    err = float(jnp.max(jnp.abs(out - ref)))
    assert jnp.allclose(out, ref, atol=1e-2, rtol=1e-2), f"mismatch vs reference, max |err| = {err}"

    print("KERNEL_OK")
</pallas_src>

<mosaic_0001>
module attributes {stable_mosaic.version = 11 : i64} {
  func.func @_mm_kernel_resident_b(%arg0: i32, %arg1: i32, %arg2: i32, %arg3: memref<64x128xbf16, #tpu.memory_space<vmem>>, %arg4: memref<128x128xbf16, #tpu.memory_space<vmem>>, %arg5: memref<64x128xbf16, #tpu.memory_space<vmem>>, %arg6: memref<64x128xf32, #tpu.memory_space<vmem>>) attributes {dimension_semantics = [#tpu.dimension_semantics<parallel>, #tpu.dimension_semantics<parallel>, #tpu.dimension_semantics<arbitrary>], iteration_bounds = array<i64: 1, 1, 1>, scalar_prefetch = 0 : i64, scratch_operands = 1 : i64, tpu.core_type = #tpu.core_type<tc>, window_params = [{transform_indices = @transform_0, window_bounds = array<i64: 64, 128>}, {transform_indices = @transform_1, window_bounds = array<i64: 128, 128>}, {transform_indices = @transform_2, window_bounds = array<i64: 64, 128>}]} {
    %c0_i32 = arith.constant 0 : i32
    %0 = arith.cmpi eq, %arg2, %c0_i32 : i32
    %1 = arith.extui %0 : i1 to i32
    %c0_i32_0 = arith.constant 0 : i32
    %2 = arith.cmpi ne, %1, %c0_i32_0 : i32
    scf.if %2 {
      %cst_9 = arith.constant 0.000000e+00 : f32
      %15 = vector.broadcast %cst_9 : f32 to vector<64x128xf32>
      %c0_10 = arith.constant 0 : index
      %c0_11 = arith.constant 0 : index
      %16 = vector.load %arg6[%c0_10, %c0_11] : memref<64x128xf32, #tpu.memory_space<vmem>>, vector<64x128xf32>
      tpu.vector_store %arg6[%c0_10, %c0_11], %15 {strides = array<i32>} : memref<64x128xf32, #tpu.memory_space<vmem>>, vector<64x128xf32>,
    } else {
    }
    %c128_i32 = arith.constant 128 : i32
    %3 = arith.muli %arg2, %c128_i32 : i32
    %4 = tpu.assume_multiple %3, 128 : i32
    %c0 = arith.constant 0 : index
    %c0_1 = arith.constant 0 : index
    %5 = vector.load %arg6[%c0, %c0_1] : memref<64x128xf32, #tpu.memory_space<vmem>>, vector<64x128xf32>
    %c0_2 = arith.constant 0 : index
    %c0_3 = arith.constant 0 : index
    %6 = vector.load %arg3[%c0_2, %c0_3] : memref<64x128xbf16, #tpu.memory_space<vmem>>, vector<64x128xbf16>
    %7 = arith.index_cast %4 : i32 to index
    %c0_4 = arith.constant 0 : index
    %8 = vector.load %arg4[%7, %c0_4] : memref<128x128xbf16, #tpu.memory_space<vmem>>, vector<128x128xbf16>
    %cst = arith.constant dense<0.000000e+00> : vector<64x128xf32>
    %9 = tpu.matmul %6, %8, %cst {dimension_numbers = #tpu.dot_dimension_numbers<[1], [0], [0], [1], [0, 0, 1, 1], [], []>} : vector<64x128xbf16>, vector<128x128xbf16>, vector<64x128xf32> -> vector<64x128xf32>
    %10 = arith.addf %5, %9 : vector<64x128xf32>
    %c0_5 = arith.constant 0 : index
    %c0_6 = arith.constant 0 : index
    %11 = vector.load %arg6[%c0_5, %c0_6] : memref<64x128xf32, #tpu.memory_space<vmem>>, vector<64x128xf32>
    tpu.vector_store %arg6[%c0_5, %c0_6], %10 {strides = array<i32>} : memref<64x128xf32, #tpu.memory_space<vmem>>, vector<64x128xf32>,
    %c0_i32_7 = arith.constant 0 : i32
    %12 = arith.cmpi eq, %arg2, %c0_i32_7 : i32
    %13 = arith.extui %12 : i1 to i32
    %c0_i32_8 = arith.constant 0 : i32
    %14 = arith.cmpi ne, %13, %c0_i32_8 : i32
    scf.if %14 {
      %c0_9 = arith.constant 0 : index
      %c0_10 = arith.constant 0 : index
      %15 = vector.load %arg6[%c0_9, %c0_10] : memref<64x128xf32, #tpu.memory_space<vmem>>, vector<64x128xf32>
      %cst_11 = arith.constant 0.000000e+00 : f32
      %16 = vector.broadcast %cst_11 : f32 to vector<64x128xf32>
      %17 = arith.maximumf %15, %16 : vector<64x128xf32>
      %18 = arith.truncf %17 : vector<64x128xf32> to vector<64x128xbf16>
      %c0_12 = arith.constant 0 : index
      %c0_13 = arith.constant 0 : index
      %19 = vector.load %arg5[%c0_12, %c0_13] : memref<64x128xbf16, #tpu.memory_space<vmem>>, vector<64x128xbf16>
      tpu.vector_store %arg5[%c0_12, %c0_13], %18 {strides = array<i32>} : memref<64x128xbf16, #tpu.memory_space<vmem>>, vector<64x128xbf16>,
    } else {
    }
    return
  }
  func.func @transform_0(%arg0: i32, %arg1: i32, %arg2: i32) -> (i32, i32) {
    %c0_i32 = arith.constant 0 : i32
    return %arg0, %arg2 : i32, i32
  }
  func.func @transform_1(%arg0: i32, %arg1: i32, %arg2: i32) -> (i32, i32) {
    %c0_i32 = arith.constant 0 : i32
    %c0_i32_0 = arith.constant 0 : i32
    return %c0_i32, %arg1 : i32, i32
  }
  func.func @transform_2(%arg0: i32, %arg1: i32, %arg2: i32) -> (i32, i32) {
    %c0_i32 = arith.constant 0 : i32
    return %arg0, %arg1 : i32, i32
  }
}

</mosaic_0001>

<bundles_post_ra>
// kernel: tpu_custom_call.1
= control target key start
LH: loop header
LB: loop body
LE: loop exit
PB: predicated region body
PF: predicated region fallthrough
CT: control target
= control target key end

     0   :  { %7 = vsyncpa [#allocation4], 0  ;;  %s579_s0 = inlined_call_operand.hbm [shape: bf16[64,128], index: 0, kind: input, shape index: {}]   ;;  %s580_s1 = inlined_call_operand.hbm [shape: bf16[128,128], index: 1, kind: input, shape index: {}]   ;;  %s581_s2 = inlined_call_operand.hbm [shape: bf16[64,128], index: 2, kind: output, shape index: {}]  }
   0x1   :  { %8 = vsyncpa [#allocation7], 0 }
   0x2   :  { %9 = vsyncpa [#allocation5], 0  ;;  %s514_s9 = smov [#allocation3]   ;;  %s442_s13 = scalar_lea.hbm %s579_s0, 512 }
   0x3   :  { %s15_s10 = sshll.u32 %s514_s9, 4  ;;  %p443_p0 = scmp.ne.s32.totalorder %s579_s0, %s442_s13  ;;  %s16_s10 = int_to_ptr.vmem [resolvable:$true] %s15_s10 }
   0x4   :  { %p446_p1 = scmp.lt.u32.totalorder %s442_s13, %s579_s0 }
   0x6   :  { %p448_p2 = pnand %p446_p1, %p443_p0 }
   0x8   :  { %451 = shalt.err (!%p448_p2)
}
   0x9   :  { %s452_s18 = scalar_lea.vmem %s16_s10, 512  ;;  %p457_p4 = scmp.lt.s32.totalorder %s16_s10, %s16_s10 }
   0xa   :  { %p453_p3 = scmp.ne.s32.totalorder %s16_s10, %s452_s18  ;;  %p458_p5 = scmp.lt.s32.totalorder %s452_s18, %s452_s18 }
   0xc   :  { %p459_p6 = por %p458_p5, %p457_p4 }
   0xe   :  { %p460_p7 = pnand %p459_p6, %p453_p3 }
  0x10   :  { %463 = shalt.err (!%p460_p7)
}
  0x11   :  { %s515_s19 = smov 64   ;;  %s516_s20 = smov 4  }
  0x12   :  { %21 = dma.hbm_to_vmem [thread:$0]  %s579_s0, 512, %s16_s10, [#allocation4], %s515_s19, %s515_s19, %s516_s20  }
  0x13   :  { %s517_s23 = smov [#allocation6]   ;;  %s464_s27 = scalar_lea.hbm %s580_s1, 1024 }
  0x14   :  { %s27_s24 = sshll.u32 %s517_s23, 4  ;;  %p465_p8 = scmp.ne.s32.totalorder %s580_s1, %s464_s27  ;;  %s28_s24 = int_to_ptr.vmem [resolvable:$true] %s27_s24 }
  0x15   :  { %p468_p9 = scmp.lt.u32.totalorder %s464_s27, %s580_s1 }
  0x17   :  { %p470_p10 = pnand %p468_p9, %p465_p8 }
  0x19   :  { %473 = shalt.err (!%p470_p10)
}
  0x1a   :  { %s474_s4 = scalar_lea.vmem %s28_s24, 1024  ;;  %p479_p12 = scmp.lt.s32.totalorder %s28_s24, %s28_s24 }
  0x1b   :  { %p475_p11 = scmp.ne.s32.totalorder %s28_s24, %s474_s4  ;;  %p480_p13 = scmp.lt.s32.totalorder %s474_s4, %s474_s4 }
  0x1d   :  { %p481_p0 = por %p480_p13, %p479_p12 }
  0x1f   :  { %p482_p1 = pnand %p481_p0, %p475_p11 }
  0x21   :  { %485 = shalt.err (!%p482_p1)
}
  0x22   :  { %33 = dma.hbm_to_vmem [thread:$0]  %s580_s1, 1024, %s28_s24, [#allocation7], %s515_s19, %s515_s19, %s516_s20  }
  0x23   :  { %508 = dma.done.wait [#allocation4], 512  }
  0x24   :  { %509 = vsyncadd [#allocation4], 4294966784 }
  0x25   :  { %510 = dma.done.wait [#allocation7], 1024  }
  0x26   :  { %511 = vsyncadd [#allocation7], 4294966272  ;;  %v430_v0 = vld [vmem:[#allocation6] sm:$0xff]   ;;  %v431_v1 = vld [vmem:[#allocation6 + $0x8] sm:$0xff]   ;;  %s518_s1 = smov [#allocation8]  }
  0x27   :  { %385 = vmatprep.subr.bf16.mxu0 %v430_v0  ;;  %409 = vmatprep.subr.bf16.mxu1 %v430_v0  ;;  %v432_v2 = vld [vmem:[#allocation6 + $0x10] sm:$0xff]   ;;  %v433_v3 = vld [vmem:[#allocation6 + $0x18] sm:$0xff]   ;;  %v438_v4 = vld [vmem:[#allocation3] sm:$0xff]   ;;  %s307_s6 = sshll.u32 %s518_s1, 4  ;;  %s308_s6 = int_to_ptr.vmem [resolvable:$true] %s307_s6 }
  0x28   :  { %386 = vmatpush3.bf16.msra.mxu0 %v430_v0  ;;  %417 = vmatpush3.bf16.msra.mxu1 %v430_v0  ;;  %v439_v5 = vld [vmem:[#allocation3 + $0x10] sm:$0xff]   ;;  %v434_v6 = vld [vmem:[#allocation6 + $0x20] sm:$0xff]   ;;  %v435_v7 = vld [vmem:[#allocation6 + $0x28] sm:$0xff]   ;;  %s486_s7 = scalar_lea.vmem %s308_s6, 512  ;;  %p491_p3 = scmp.lt.s32.totalorder %s308_s6, %s308_s6 }
  0x29   :  { %387 = vmatprep.subr.bf16.mxu0 %v431_v1  ;;  %410 = vmatprep.subr.bf16.mxu1 %v431_v1  ;;  %v436_v8 = vld [vmem:[#allocation6 + $0x30] sm:$0xff]   ;;  %v437_v9 = vld [vmem:[#allocation6 + $0x38] sm:$0xff]   ;;  %v440_v10 = vld [vmem:[#allocation3 + $0x8] sm:$0xff]   ;;  %p487_p2 = scmp.ne.s32.totalorder %s308_s6, %s486_s7  ;;  %p492_p4 = scmp.lt.s32.totalorder %s486_s7, %s486_s7 }
  0x2a   :  { %401 = vmatprep.mubr.bf16.mxu0 %v438_v4  ;;  %405 = vmatprep.mubr.bf16.mxu1 %v439_v5  ;;  %v441_v11 = vld [vmem:[#allocation3 + $0x18] sm:$0xff]  }
  0x2b   :  { %p493_p5 = por %p492_p4, %p491_p3 }
  0x2c   :  { %388 = vmatpush3.bf16.msra.mxu0 %v431_v1  ;;  %418 = vmatpush3.bf16.msra.mxu1 %v431_v1 }
  0x2d   :  { %389 = vmatprep.subr.bf16.mxu0 %v432_v2  ;;  %411 = vmatprep.subr.bf16.mxu1 %v432_v2  ;;  %p494_p6 = pnand %p493_p5, %p487_p2 }
  0x30   :  { %390 = vmatpush3.bf16.msra.mxu0 %v432_v2  ;;  %419 = vmatpush3.bf16.msra.mxu1 %v432_v2 }
  0x31   :  { %391 = vmatprep.subr.bf16.mxu0 %v433_v3  ;;  %412 = vmatprep.subr.bf16.mxu1 %v433_v3 }
  0x34   :  { %392 = vmatpush3.bf16.msra.mxu0 %v433_v3  ;;  %420 = vmatpush3.bf16.msra.mxu1 %v433_v3 }
  0x35   :  { %393 = vmatprep.subr.bf16.mxu0 %v434_v6  ;;  %413 = vmatprep.subr.bf16.mxu1 %v434_v6 }
  0x38   :  { %394 = vmatpush3.bf16.msra.mxu0 %v434_v6  ;;  %421 = vmatpush3.bf16.msra.mxu1 %v434_v6 }
  0x39   :  { %395 = vmatprep.subr.bf16.mxu0 %v435_v7  ;;  %414 = vmatprep.subr.bf16.mxu1 %v435_v7 }
  0x3c   :  { %396 = vmatpush3.bf16.msra.mxu0 %v435_v7  ;;  %422 = vmatpush3.bf16.msra.mxu1 %v435_v7 }
  0x3d   :  { %397 = vmatprep.subr.bf16.mxu0 %v436_v8  ;;  %415 = vmatprep.subr.bf16.mxu1 %v436_v8 }
  0x40   :  { %398 = vmatpush3.bf16.msra.mxu0 %v436_v8  ;;  %423 = vmatpush3.bf16.msra.mxu1 %v436_v8 }
  0x41   :  { %399 = vmatprep.subr.bf16.mxu0 %v437_v9  ;;  %416 = vmatprep.subr.bf16.mxu1 %v437_v9 }
  0x44   :  { %400 = vmatpush3.bf16.msra.mxu0 %v437_v9  ;;  %424 = vmatpush3.bf16.msra.mxu1 %v437_v9 }
  0x47   :  { %402 = vmatmul.mubr.bf16.vlgmr.msra.gmra.mrb[0].mxu0 %v440_v10  ;;  %406 = vmatmul.mubr.bf16.vlgmr.msra.gmra.mrb[0].mxu1 %v441_v11 }
 0x11a   :  { %v403_v12 = vpop.f32.mrb[0].mxu0  ;;  %v407_v13 = vpop.f32.mrb[0].mxu1 }
 0x11b   :  { %v196_v14 = vpop.f32.mrb[1].mxu0  ;;  %v212_v15 = vpop.f32.mrb[1].mxu1  ;;  %v256_v18 = vmax.f32 %v403_v12, 0.0  ;;  %v260_v19 = vmax.f32 %v407_v13, 0.0 }
 0x11c   :  { %v404_v16 = vpop.f32.mrb[2].mxu0  ;;  %v408_v17 = vpop.f32.mrb[2].mxu1  ;;  %v254_v24 = vmax.f32 %v196_v14, 0.0  ;;  %v258_v25 = vmax.f32 %v212_v15, 0.0 }
 0x11d   :  { %v257_v20 = vmax.f32 %v404_v16, 0.0  ;;  %v261_v21 = vmax.f32 %v408_v17, 0.0  ;;  %v199_v22 = vpop.f32.mrb[3].mxu0  ;;  %v215_v23 = vpop.f32.mrb[3].mxu1 }
 0x11e   :  { %v255_v26 = vmax.f32 %v199_v22, 0.0  ;;  %v259_v27 = vmax.f32 %v215_v23, 0.0 }
 0x11f   :  { %v358_v28 = vpack.c.bf16 %v257_v20, %v256_v18  ;;  %v368_v29 = vpack.c.bf16 %v261_v21, %v260_v19 }
 0x120   :  { %v353_v30 = vpack.c.bf16 %v255_v26, %v254_v24  ;;  %v363_v31 = vpack.c.bf16 %v259_v27, %v258_v25 }
 0x121   :  { %370 = vst [vmem:[#allocation8 + $0x8] sm:$0xff] %v358_v28   ;;  %372 = vst [vmem:[#allocation8 + $0x18] sm:$0xff] %v368_v29  }
 0x122   :  { %354 = vst [vmem:[#allocation8] sm:$0xff] %v353_v30   ;;  %371 = vst [vmem:[#allocation8 + $0x10] sm:$0xff] %v363_v31  }
 0x123   :  { %497 = shalt.err (!%p494_p6)
}
 0x124   :  { %s498_s10 = scalar_lea.hbm %s581_s2, 512 }
 0x125   :  { %p499_p7 = scmp.ne.s32.totalorder %s581_s2, %s498_s10  ;;  %p502_p8 = scmp.lt.u32.totalorder %s498_s10, %s581_s2 }
 0x127   :  { %p504_p9 = pnand %p502_p8, %p499_p7 }
 0x129   :  { %507 = shalt.err (!%p504_p9)
}
 0x12a   :  { %313 = dma.vmem_to_hbm [thread:$0]  %s308_s6, 512, %s581_s2, [#allocation5], %s515_s19, %s515_s19, %s516_s20  }
 0x12b   :  { %512 = dma.done.wait [#allocation5], 512  }
 0x12c   :  { %513 = vsyncadd [#allocation5], 4294966784 }
 0x12d   :  { %317 = vsyncpa [#allocation4], 1 }
 0x12e   :  { %318 = vsyncpa [#allocation7], 1 }
 0x12f   :  { %319 = vsyncpa [#allocation5], 1 }

</bundles_post_ra>
